<compile_context>
chip_gen: v5e
topology: v5e:2x2
jax: 0.10.0
libtpu: 0.0.40
codegen_flags: <defaults>
</compile_context>

<pallas_src>
import functools

import numpy as np
import jax
import jax.numpy as jnp
from jax import lax
from jax.experimental import pallas as pl
from jax.experimental.pallas import tpu as pltpu


_CONTRACT_DIM1 = (((1,), (1,)), ((), ()))   # dot_general: contract dim 1 of both (A @ B.T)
_BIG = 1e9                                  # "norm" sentinel for padded rows/cols -> hinge 0
_ROW_PAD_PID = -2147483647                  # row/col pad sentinels differ and are assumed
_COL_PAD_PID = -2147483648                  # never to collide with real (non-negative) pids


def _hcc_kernel(lhs_ref, rown_ref, pids_ref, rhs_ref, coln_ref, colhalf_ref, pidhc_ref,
                out1_ref, out2_ref, *, margin, dist_kind, tile_n, n_half,
                tiles_per_split, rows_aligned):
    i = pl.program_id(1)                                  # tile index within this core-split

    @pl.when(i == 0)
    def _init():
        out1_ref[...] = jnp.zeros_like(out1_ref)
        out2_ref[...] = jnp.zeros_like(out2_ref)

    # Single fused MXU pass:  euc -> x @ h^T ;  kl -> [p | log p] @ [log h | h]^T
    dot = lax.dot_general(lhs_ref[...], rhs_ref[...], _CONTRACT_DIM1,
                          preferred_element_type=jnp.float32)      # (tile_n, m_pad) f32
    if dist_kind == "euc":
        d2 = rown_ref[...] + coln_ref[...] - 2.0 * dot
        dist = jnp.sqrt(jnp.maximum(d2, 1e-12))
    else:                                                          # symmetric KL
        dist = rown_ref[...] + coln_ref[...] - dot

    mask = pids_ref[...] == pidhc_ref[...]                         # same-id (tile_n, m_pad)
    colhalf = colhalf_ref[...]                                     # (1, m_pad): 1.0 iff col < m//2

    row_start = (pl.program_id(0) * tiles_per_split + i) * tile_n
    if rows_aligned:
        # tiles never straddle the N/2 boundary -> scalar row-half test
        w = jnp.where(row_start < n_half, 1.0 - colhalf, colhalf)          # (1, m_pad)
    else:
        rid = lax.broadcasted_iota(jnp.int32, (tile_n, 1), 0) + row_start
        rf = (rid < n_half).astype(jnp.float32)
        w = rf * (1.0 - colhalf) + (1.0 - rf) * colhalf                     # (tile_n, m_pad)

    pos = jnp.where(mask, dist, 0.0) * w                           # positive (same-id, cross-half)
    neg = jnp.where(mask, 0.0, jnp.maximum(margin - dist, 0.0))    # hinge on negatives
    # padded rows/cols have dist ~ _BIG (hinge 0) and sentinel pids (mask False), so they add 0.

    # Sublane-only reduction; lane-wise collapse is deferred to the wrapper.
    out1_ref[0:1, :] += jnp.sum(pos, axis=0, keepdims=True)
    out2_ref[0:1, :] += jnp.sum(neg, axis=0, keepdims=True)


def _usable_vmem_bytes():
    try:
        cap = int(pltpu.get_tpu_info().vmem_capacity_bytes)
    except Exception:
        cap = 0
    if cap <= 0:
        cap = 64 * 1024 * 1024            # conservative default (v7x has 64 MiB / TC)
    return max(cap - 8 * 1024 * 1024, 16 * 1024 * 1024)


def _lane(v):
    return ((v + 127) // 128) * 128


def _pick_tile_n(n, ck, m_pad, usable_vmem):
    """m_pad-aware tile pick: budget the (tile_n, m_pad) f32 intermediates, not just x."""
    resident = 2 * m_pad * _lane(ck) * 2 + 6 * 8 * m_pad * 4 + 2 * 2 * 8 * m_pad * 4
    budget = max(usable_vmem // 2 - resident, 4 * 1024 * 1024)
    per_row = 2 * _lane(ck) * 2 + 2 * 2 * 128 * 4 + 8 * 4 * m_pad
    cap = budget // max(per_row, 1)
    cap = max(16, min(int(cap), 2048))
    tile = min(((max(n, 16) + 15) // 16) * 16, (cap // 16) * 16)
    return max(16, tile)


def _vmem_limit_bytes(tile_n, ck, m_pad, usable_vmem):
    b = 2 * tile_n * _lane(ck) * 2            # lhs bf16 tile, double-buffered
    b += 2 * 2 * tile_n * 128 * 4             # rown + pids tiles (lane-padded), double-buffered
    b += 2 * m_pad * _lane(ck) * 2            # resident rhs bf16 (still allocated x2)
    b += 2 * 3 * 8 * m_pad * 4                # coln / colhalf / pidhc rows (sublane-padded, x2)
    b += 2 * 2 * 8 * m_pad * 4                # the two (8, m_pad) f32 accumulator outputs
    b += 8 * tile_n * m_pad * 4               # live f32 intermediates (dot/dist/pos/neg/...)
    b += 4 * 1024 * 1024                      # headroom
    return int(min(max(b, 16 * 1024 * 1024), usable_vmem))


def hcc_forward(x, pids, d="euc", margin_euc=0.6, margin_kl=6.0,
                num_ids=None, tile_n=None):
    """JAX/Pallas equivalent of hcc.forward(x, pids, d)."""
    x = x.astype(jnp.float32)
    pids = pids.astype(jnp.int32)
    n, c = x.shape

    if num_ids is None:
        # TODO(synk): host sync + non-jittable fallback; pass num_ids statically instead.
        num_ids = int(np.unique(np.asarray(pids)).shape[0])
    p = int(num_ids)
    m = 2 * p
    m_pad = ((m + 127) // 128) * 128

    # ---------------- center-side precomputation (hoisted out of the kernel) ----------------
    if d == "kl":
        margin = float(margin_kl)
        lp_raw = jax.nn.log_softmax(x, axis=-1)
        probs = jnp.exp(lp_raw)                                      # == softmax(x)
        logp = jnp.maximum(lp_raw, float(np.log(1e-9)))              # == log(clamp(p, 1e-9))
        hcen = probs.reshape(m, -1, c).mean(axis=1)                  # (m, c) cluster centers
        logh = jnp.log(jnp.maximum(hcen, 1e-9))
        rown = jnp.sum(probs * logp, axis=1, keepdims=True)          # e1  (n, 1)
        coln = jnp.sum(hcen * logh, axis=1)                          # e2  (m,)
        lhs = jnp.concatenate([probs, logp], axis=1)                 # (n, 2c)  -> one MXU pass
        rhs = jnp.concatenate([logh, hcen], axis=1)                  # (m, 2c)
        ck = 2 * c
    else:
        margin = float(margin_euc)
        hcen = x.reshape(m, -1, c).mean(axis=1)                      # (m, c)
        rown = jnp.sum(x * x, axis=1, keepdims=True)                 # |x|^2  (n, 1)
        coln = jnp.sum(hcen * hcen, axis=1)                          # |h|^2  (m,)
        lhs = x
        rhs = hcen
        ck = c

    pidhc = pids.reshape(m, -1)[:, 0]                                # (m,) center pids

    # ------------- loss-term counts: pid-only, computed once with a tiny XLA reduce -------------
    mask_full = pids.reshape(n, 1) == pidhc.reshape(1, m)
    region = jnp.logical_xor((jnp.arange(n) < n // 2).reshape(n, 1),
                             (jnp.arange(m) < m // 2).reshape(1, m))
    cnt1 = jnp.sum(jnp.logical_and(mask_full, region).astype(jnp.float32))
    cnt2 = jnp.float32(n * m) - jnp.sum(mask_full.astype(jnp.float32))

    # ---------------------------------- tiling / padding ----------------------------------
    usable_vmem = _usable_vmem_bytes()
    if tile_n is None:
        tile_n = _pick_tile_n(n, ck, m_pad, usable_vmem)
    tile_n = max(16, ((int(tile_n) + 15) // 16) * 16)                # bf16 sublane tiling

    num_tiles = -(-n // tile_n)
    splits = 2 if num_tiles >= 2 else 1                              # feed both v7x TensorCores
    num_tiles = -(-num_tiles // splits) * splits
    tiles_per_split = num_tiles // splits
    n_pad = num_tiles * tile_n
    n_half = n // 2
    rows_aligned = (n_half % tile_n == 0)

    pad_r = n_pad - n
    pad_c = m_pad - m
    lhs_p = jnp.pad(lhs, ((0, pad_r), (0, 0))).astype(jnp.bfloat16)
    rown_p = jnp.pad(rown, ((0, pad_r), (0, 0)), constant_values=_BIG)
    pids_p = jnp.pad(pids.reshape(n, 1), ((0, pad_r), (0, 0)),
                     constant_values=_ROW_PAD_PID)
    rhs_p = jnp.pad(rhs, ((0, pad_c), (0, 0))).astype(jnp.bfloat16)
    coln_p = jnp.pad(coln, (0, pad_c), constant_values=_BIG).reshape(1, m_pad)
    pidhc_p = jnp.pad(pidhc, (0, pad_c), constant_values=_COL_PAD_PID).reshape(1, m_pad)
    colhalf = (jnp.arange(m_pad) < (m // 2)).astype(jnp.float32).reshape(1, m_pad)

    kernel = functools.partial(
        _hcc_kernel, margin=margin, dist_kind=("kl" if d == "kl" else "euc"),
        tile_n=tile_n, n_half=n_half, tiles_per_split=tiles_per_split,
        rows_aligned=rows_aligned)

    row_map = lambda s, i: (s * tiles_per_split + i, 0)
    res_map = lambda s, i: (0, 0)
    out_map = lambda s, i: (s, 0)

    out_spec = pl.BlockSpec((8, m_pad), out_map)
    out_sds = jax.ShapeDtypeStruct((splits * 8, m_pad), jnp.float32)

    flops = 2 * n_pad * m_pad * ck + 12 * n_pad * m_pad
    transcend = n_pad * m_pad if d != "kl" else 0
    bytes_accessed = (n_pad * ck * 2 + n_pad * 8 + m_pad * ck * 2
                      + 3 * m_pad * 4 + 2 * splits * 8 * m_pad * 4)

    out1, out2 = pl.pallas_call(
        kernel,
        out_shape=(out_sds, out_sds),
        grid=(splits, tiles_per_split),
        in_specs=[
            pl.BlockSpec((tile_n, ck), row_map),     # lhs   (bf16)
            pl.BlockSpec((tile_n, 1), row_map),      # rown  (|x|^2 or e1, f32)
            pl.BlockSpec((tile_n, 1), row_map),      # pids  (int32)
            pl.BlockSpec((m_pad, ck), res_map),      # rhs   (bf16, resident)
            pl.BlockSpec((1, m_pad), res_map),       # coln  (|h|^2 or e2, resident)
            pl.BlockSpec((1, m_pad), res_map),       # column-half mask (resident)
            pl.BlockSpec((1, m_pad), res_map),       # pidhc (resident)
        ],
        out_specs=(out_spec, out_spec),
        compiler_params=pltpu.CompilerParams(
            dimension_semantics=("parallel", "arbitrary"),
            vmem_limit_bytes=_vmem_limit_bytes(tile_n, ck, m_pad, usable_vmem)),
        cost_estimate=pl.CostEstimate(flops=flops, transcendentals=transcend,
                                      bytes_accessed=bytes_accessed),
    )(lhs_p, rown_p, pids_p, rhs_p, coln_p, colhalf, pidhc_p)

    loss1 = jnp.sum(out1) / cnt1
    loss2 = jnp.sum(out2) / cnt2
    return loss1 + loss2


# ----------------------------- pure-numpy reference -----------------------------
def _softmax_np(x):
    z = x - x.max(axis=-1, keepdims=True)
    e = np.exp(z)
    return e / e.sum(axis=-1, keepdims=True)


def hcc_reference(x, pids, d="euc", margin_euc=0.6, margin_kl=6.0):
    x = np.asarray(x, np.float32)
    pids = np.asarray(pids)
    if d == "kl":
        margin = margin_kl
        x = _softmax_np(x)
    else:
        margin = margin_euc
    p = len(np.unique(pids))
    c = x.shape[-1]
    pidhc = pids.reshape(2 * p, -1)[:, 0]
    hcen = x.reshape(2 * p, -1, c).mean(axis=1)
    if d == "euc":
        d2 = (x ** 2).sum(1)[:, None] + (hcen ** 2).sum(1)[None, :] - 2.0 * x @ hcen.T
        dist = np.sqrt(np.clip(d2, 1e-12, None))
    else:
        lx = np.log(np.clip(x, 1e-9, None))
        lh = np.log(np.clip(hcen, 1e-9, None))
        dist = ((x * lx).sum(1)[:, None] + (hcen * lh).sum(1)[None, :]
                - x @ lh.T - lx @ hcen.T)
    mask = pids[:, None] == pidhc[None, :]
    n, m = dist.shape
    vals1 = []
    for i in range(n // 2):
        vals1.append(dist[i, m // 2:][mask[i, m // 2:]])
    for i in range(n // 2, n):
        vals1.append(dist[i, :m // 2][mask[i, :m // 2]])
    loss1 = np.concatenate(vals1).mean()
    vals2 = [np.clip(margin - dist[i][~mask[i]], 0.0, None) for i in range(n)]
    loss2 = np.concatenate(vals2).mean()
    return float(loss1 + loss2)


if __name__ == "__main__":
    key = jax.random.PRNGKey(0)

    # Batch layout expected by hcc: two "halves", each containing K instances of
    # each of P identities; N = 2 * P * K, and pids.reshape(2P, -1)[:, 0] gives
    # the identity of each of the 2P clusters.
    P, K, C = 4, 8, 32
    N = 2 * P * K  # 64
    x = 0.1 * jax.random.normal(key, (N, C), dtype=jnp.float32)
    pids = jnp.array(
        [pid for _half in range(2) for pid in range(P) for _ in range(K)],
        dtype=jnp.int32,
    )

    # tile_n=16 exercises the gridded accumulation path (2 core-splits x 2 tiles).
    out_euc = hcc_forward(x, pids, d="euc", num_ids=P, tile_n=16)
    jax.block_until_ready(out_euc)
    out_kl = hcc_forward(x, pids, d="kl", num_ids=P, tile_n=16)
    jax.block_until_ready(out_kl)
    out_euc_auto = hcc_forward(x, pids, d="euc", num_ids=P)   # auto tile (single-tile path)
    jax.block_until_ready(out_euc_auto)

    ref_euc = hcc_reference(np.asarray(x), np.asarray(pids), d="euc")
    ref_kl = hcc_reference(np.asarray(x), np.asarray(pids), d="kl")

    np.testing.assert_allclose(float(out_euc), ref_euc, rtol=1e-2, atol=1e-2)
    np.testing.assert_allclose(float(out_euc_auto), ref_euc, rtol=1e-2, atol=1e-2)
    np.testing.assert_allclose(float(out_kl), ref_kl, rtol=1e-2, atol=1e-2)

    print("KERNEL_OK")
</pallas_src>

<mosaic_0001>
module attributes {stable_mosaic.version = 11 : i64} {
  func.func @_hcc_kernel(%arg0: i32, %arg1: i32, %arg2: memref<16x32xbf16, #tpu.memory_space<vmem>>, %arg3: memref<16x1xf32, #tpu.memory_space<vmem>>, %arg4: memref<16x1xi32, #tpu.memory_space<vmem>>, %arg5: memref<128x32xbf16, #tpu.memory_space<vmem>>, %arg6: memref<1x128xf32, #tpu.memory_space<vmem>>, %arg7: memref<1x128xf32, #tpu.memory_space<vmem>>, %arg8: memref<1x128xi32, #tpu.memory_space<vmem>>, %arg9: memref<8x128xf32, #tpu.memory_space<vmem>>, %arg10: memref<8x128xf32, #tpu.memory_space<vmem>>) attributes {dimension_semantics = [#tpu.dimension_semantics<parallel>, #tpu.dimension_semantics<arbitrary>], iteration_bounds = array<i64: 2, 2>, scalar_prefetch = 0 : i64, scratch_operands = 0 : i64, tpu.core_type = #tpu.core_type<tc>, window_params = [{transform_indices = @transform_0, window_bounds = array<i64: 16, 32>}, {transform_indices = @transform_1, window_bounds = array<i64: 16, 1>}, {transform_indices = @transform_2, window_bounds = array<i64: 16, 1>}, {pipeline_mode = #tpu.pipeline_mode<synchronous>, transform_indices = @transform_3, window_bounds = array<i64: 128, 32>}, {pipeline_mode = #tpu.pipeline_mode<synchronous>, transform_indices = @transform_4, window_bounds = array<i64: 1, 128>}, {pipeline_mode = #tpu.pipeline_mode<synchronous>, transform_indices = @transform_5, window_bounds = array<i64: 1, 128>}, {pipeline_mode = #tpu.pipeline_mode<synchronous>, transform_indices = @transform_6, window_bounds = array<i64: 1, 128>}, {transform_indices = @transform_7, window_bounds = array<i64: 8, 128>}, {transform_indices = @transform_8, window_bounds = array<i64: 8, 128>}]} {
    %c0_i32 = arith.constant 0 : i32
    %0 = arith.cmpi eq, %arg1, %c0_i32 : i32
    %1 = arith.extui %0 : i1 to i32
    %c0_i32_0 = arith.constant 0 : i32
    %2 = arith.cmpi ne, %1, %c0_i32_0 : i32
    scf.if %2 {
      %cst_31 = arith.constant 0.000000e+00 : f32
      %50 = vector.broadcast %cst_31 : f32 to vector<8x128xf32>
      %c0_32 = arith.constant 0 : index
      %c0_33 = arith.constant 0 : index
      %51 = vector.load %arg9[%c0_32, %c0_33] : memref<8x128xf32, #tpu.memory_space<vmem>>, vector<8x128xf32>
      tpu.vector_store %arg9[%c0_32, %c0_33], %50 {strides = array<i32>} : memref<8x128xf32, #tpu.memory_space<vmem>>, vector<8x128xf32>,
      %cst_34 = arith.constant 0.000000e+00 : f32
      %52 = vector.broadcast %cst_34 : f32 to vector<8x128xf32>
      %c0_35 = arith.constant 0 : index
      %c0_36 = arith.constant 0 : index
      %53 = vector.load %arg10[%c0_35, %c0_36] : memref<8x128xf32, #tpu.memory_space<vmem>>, vector<8x128xf32>
      tpu.vector_store %arg10[%c0_35, %c0_36], %52 {strides = array<i32>} : memref<8x128xf32, #tpu.memory_space<vmem>>, vector<8x128xf32>,
    } else {
    }
    %c0 = arith.constant 0 : index
    %c0_1 = arith.constant 0 : index
    %3 = vector.load %arg2[%c0, %c0_1] : memref<16x32xbf16, #tpu.memory_space<vmem>>, vector<16x32xbf16>
    %c0_2 = arith.constant 0 : index
    %c0_3 = arith.constant 0 : index
    %4 = vector.load %arg5[%c0_2, %c0_3] : memref<128x32xbf16, #tpu.memory_space<vmem>>, vector<128x32xbf16>
    %cst = arith.constant dense<0.000000e+00> : vector<16x128xf32>
    %5 = tpu.matmul %3, %4, %cst {dimension_numbers = #tpu.dot_dimension_numbers<[1], [1], [0], [0], [0, 0, 1, 0], [], []>} : vector<16x32xbf16>, vector<128x32xbf16>, vector<16x128xf32> -> vector<16x128xf32>
    %c0_4 = arith.constant 0 : index
    %c0_5 = arith.constant 0 : index
    %6 = vector.load %arg3[%c0_4, %c0_5] : memref<16x1xf32, #tpu.memory_space<vmem>>, vector<16x1xf32>
    %c0_6 = arith.constant 0 : index
    %c0_7 = arith.constant 0 : index
    %7 = vector.load %arg6[%c0_6, %c0_7] : memref<1x128xf32, #tpu.memory_space<vmem>>, vector<1x128xf32>
    %8 = vector.broadcast %6 : vector<16x1xf32> to vector<16x128xf32>
    %9 = vector.broadcast %7 : vector<1x128xf32> to vector<16x128xf32>
    %10 = arith.addf %8, %9 : vector<16x128xf32>
    %cst_8 = arith.constant 2.000000e+00 : f32
    %11 = vector.broadcast %cst_8 : f32 to vector<16x128xf32>
    %12 = arith.mulf %11, %5 : vector<16x128xf32>
    %13 = arith.subf %10, %12 : vector<16x128xf32>
    %cst_9 = arith.constant 9.99999996E-13 : f32
    %14 = vector.broadcast %cst_9 : f32 to vector<16x128xf32>
    %15 = arith.maximumf %13, %14 : vector<16x128xf32>
    %16 = math.sqrt %15 : vector<16x128xf32>
    %c0_10 = arith.constant 0 : index
    %c0_11 = arith.constant 0 : index
    %17 = vector.load %arg4[%c0_10, %c0_11] : memref<16x1xi32, #tpu.memory_space<vmem>>, vector<16x1xi32>
    %c0_12 = arith.constant 0 : index
    %c0_13 = arith.constant 0 : index
    %18 = vector.load %arg8[%c0_12, %c0_13] : memref<1x128xi32, #tpu.memory_space<vmem>>, vector<1x128xi32>
    %19 = vector.broadcast %17 : vector<16x1xi32> to vector<16x128xi32>
    %20 = vector.broadcast %18 : vector<1x128xi32> to vector<16x128xi32>
    %21 = arith.cmpi eq, %19, %20 : vector<16x128xi32>
    %c0_14 = arith.constant 0 : index
    %c0_15 = arith.constant 0 : index
    %22 = vector.load %arg7[%c0_14, %c0_15] : memref<1x128xf32, #tpu.memory_space<vmem>>, vector<1x128xf32>
    %c2_i32 = arith.constant 2 : i32
    %23 = arith.muli %arg0, %c2_i32 : i32
    %24 = arith.addi %23, %arg1 : i32
    %c16_i32 = arith.constant 16 : i32
    %25 = arith.muli %24, %c16_i32 : i32
    %c32_i32 = arith.constant 32 : i32
    %26 = arith.cmpi slt, %25, %c32_i32 : i32
    %cst_16 = arith.constant 1.000000e+00 : f32
    %27 = vector.broadcast %cst_16 : f32 to vector<1x128xf32>
    %28 = arith.subf %27, %22 : vector<1x128xf32>
    %29 = arith.select %26, %28, %22 : vector<1x128xf32>
    %cst_17 = arith.constant 0.000000e+00 : f32
    %30 = vector.broadcast %cst_17 : f32 to vector<16x128xf32>
    %31 = arith.select %21, %16, %30 : vector<16x128xi1>, vector<16x128xf32>
    %32 = vector.broadcast %29 : vector<1x128xf32> to vector<16x128xf32>
    %33 = arith.mulf %31, %32 : vector<16x128xf32>
    %cst_18 = arith.constant 6.000000e-01 : f32
    %34 = vector.broadcast %cst_18 : f32 to vector<16x128xf32>
    %35 = arith.subf %34, %16 : vector<16x128xf32>
    %cst_19 = arith.constant 0.000000e+00 : f32
    %36 = vector.broadcast %cst_19 : f32 to vector<16x128xf32>
    %37 = arith.maximumf %35, %36 : vector<16x128xf32>
    %cst_20 = arith.constant 0.000000e+00 : f32
    %38 = vector.broadcast %cst_20 : f32 to vector<16x128xf32>
    %39 = arith.select %21, %38, %37 : vector<16x128xi1>, vector<16x128xf32>
    %c0_21 = arith.constant 0 : index
    %c0_22 = arith.constant 0 : index
    %40 = vector.load %arg9[%c0_21, %c0_22] : memref<8x128xf32, #tpu.memory_space<vmem>>, vector<1x128xf32>
    %cst_23 = arith.constant dense<0.000000e+00> : vector<128xf32>
    %41 = vector.multi_reduction <add>, %33, %cst_23 [0] : vector<16x128xf32> to vector<128xf32>
    %42 = vector.shape_cast %41 : vector<128xf32> to vector<1x128xf32>
    %43 = arith.addf %40, %42 : vector<1x128xf32>
    %c0_24 = arith.constant 0 : index
    %c0_25 = arith.constant 0 : index
    %44 = vector.load %arg9[%c0_24, %c0_25] : memref<8x128xf32, #tpu.memory_space<vmem>>, vector<1x128xf32>
    tpu.vector_store %arg9[%c0_24, %c0_25], %43 {strides = array<i32>} : memref<8x128xf32, #tpu.memory_space<vmem>>, vector<1x128xf32>,
    %c0_26 = arith.constant 0 : index
    %c0_27 = arith.constant 0 : index
    %45 = vector.load %arg10[%c0_26, %c0_27] : memref<8x128xf32, #tpu.memory_space<vmem>>, vector<1x128xf32>
    %cst_28 = arith.constant dense<0.000000e+00> : vector<128xf32>
    %46 = vector.multi_reduction <add>, %39, %cst_28 [0] : vector<16x128xf32> to vector<128xf32>
    %47 = vector.shape_cast %46 : vector<128xf32> to vector<1x128xf32>
    %48 = arith.addf %45, %47 : vector<1x128xf32>
    %c0_29 = arith.constant 0 : index
    %c0_30 = arith.constant 0 : index
    %49 = vector.load %arg10[%c0_29, %c0_30] : memref<8x128xf32, #tpu.memory_space<vmem>>, vector<1x128xf32>
    tpu.vector_store %arg10[%c0_29, %c0_30], %48 {strides = array<i32>} : memref<8x128xf32, #tpu.memory_space<vmem>>, vector<1x128xf32>,
    return
  }
  func.func @transform_0(%arg0: i32, %arg1: i32) -> (i32, i32) {
    %c2_i32 = arith.constant 2 : i32
    %0 = arith.muli %arg0, %c2_i32 : i32
    %1 = arith.addi %0, %arg1 : i32
    %c0_i32 = arith.constant 0 : i32
    %c0_i32_0 = arith.constant 0 : i32
    return %1, %c0_i32 : i32, i32
  }
  func.func @transform_1(%arg0: i32, %arg1: i32) -> (i32, i32) {
    %c2_i32 = arith.constant 2 : i32
    %0 = arith.muli %arg0, %c2_i32 : i32
    %1 = arith.addi %0, %arg1 : i32
    %c0_i32 = arith.constant 0 : i32
    %c0_i32_0 = arith.constant 0 : i32
    return %1, %c0_i32 : i32, i32
  }
  func.func @transform_2(%arg0: i32, %arg1: i32) -> (i32, i32) {
    %c2_i32 = arith.constant 2 : i32
    %0 = arith.muli %arg0, %c2_i32 : i32
    %1 = arith.addi %0, %arg1 : i32
    %c0_i32 = arith.constant 0 : i32
    %c0_i32_0 = arith.constant 0 : i32
    return %1, %c0_i32 : i32, i32
  }
  func.func @transform_3(%arg0: i32, %arg1: i32) -> (i32, i32) {
    %c0_i32 = arith.constant 0 : i32
    %c0_i32_0 = arith.constant 0 : i32
    %c0_i32_1 = arith.constant 0 : i32
    return %c0_i32, %c0_i32_0 : i32, i32
  }
  func.func @transform_4(%arg0: i32, %arg1: i32) -> (i32, i32) {
    %c0_i32 = arith.constant 0 : i32
    %c0_i32_0 = arith.constant 0 : i32
    %c0_i32_1 = arith.constant 0 : i32
    return %c0_i32, %c0_i32_0 : i32, i32
  }
  func.func @transform_5(%arg0: i32, %arg1: i32) -> (i32, i32) {
    %c0_i32 = arith.constant 0 : i32
    %c0_i32_0 = arith.constant 0 : i32
    %c0_i32_1 = arith.constant 0 : i32
    return %c0_i32, %c0_i32_0 : i32, i32
  }
  func.func @transform_6(%arg0: i32, %arg1: i32) -> (i32, i32) {
    %c0_i32 = arith.constant 0 : i32
    %c0_i32_0 = arith.constant 0 : i32
    %c0_i32_1 = arith.constant 0 : i32
    return %c0_i32, %c0_i32_0 : i32, i32
  }
  func.func @transform_7(%arg0: i32, %arg1: i32) -> (i32, i32) {
    %c0_i32 = arith.constant 0 : i32
    %c0_i32_0 = arith.constant 0 : i32
    return %arg0, %c0_i32 : i32, i32
  }
  func.func @transform_8(%arg0: i32, %arg1: i32) -> (i32, i32) {
    %c0_i32 = arith.constant 0 : i32
    %c0_i32_0 = arith.constant 0 : i32
    return %arg0, %c0_i32 : i32, i32
  }
}

</mosaic_0001>

<bundles_post_ra>
// kernel: tpu_custom_call.1
= control target key start
LH: loop header
LB: loop body
LE: loop exit
PB: predicated region body
PF: predicated region fallthrough
CT: control target
= control target key end

     0   :  { %14 = vsyncpa [#allocation3], 0  ;;  %s1349_s0 = inlined_call_operand.vmem [shape: bf16[64,32], index: 0, kind: input, shape index: {}]   ;;  %s1350_s1 = inlined_call_operand.vmem [shape: f32[64,1], index: 1, kind: input, shape index: {}]   ;;  %s1351_s2 = inlined_call_operand.vmem [shape: s32[64,1], index: 2, kind: input, shape index: {}]   ;;  %s1352_s3 = inlined_call_operand.vmem [shape: bf16[128,32], index: 3, kind: input, shape index: {}]   ;;  %s1353_s4 = inlined_call_operand.vmem [shape: f32[1,128], index: 4, kind: input, shape index: {}]   ;;  %s1354_s5 = inlined_call_operand.vmem [shape: f32[1,128], index: 5, kind: input, shape index: {}]   ;;  %s1355_s6 = inlined_call_operand.vmem [shape: s32[1,128], index: 6, kind: input, shape index: {}]   ;;  %s1356_s7 = inlined_call_operand.hbm [shape: f32[16,128], index: 7, kind: output, shape index: {0}]   ;;  %s1357_s8 = inlined_call_operand.hbm [shape: f32[16,128], index: 8, kind: output, shape index: {1}]  }
   0x1   :  { %16 = vsyncpa [#allocation3 + $0x1], 0 }
   0x2   :  { %17 = vsyncpa [#allocation5], 0 }
   0x3   :  { %19 = vsyncpa [#allocation5 + $0x1], 0  ;;  %s1129_s27 = smov 0   ;;  %s1131_s28 = smov 0  }
   0x4   :  { %s1133_s29 = smov 0   ;;  %s1135_s30 = smov 0  }
   0x5   :  { %s1137_s9 = smov 0   ;;  %s1139_s10 = smov 0  }
   0x6   :  { %s1141_s11 = smov 0   ;;  %s1143_s12 = smov 0  }
   0x7 LB: > { %1364 = sst [smem:[#allocation8_spill]] %s1056_s28  ;;  %s791_s13 = sadd.s32 4294967295, %s1080_s12   ;;  %s1080_s12 = sphi %s1143_s12, %s25_s12   ;;  %s1076_s11 = sphi %s1141_s11, %s1381_s11   ;;  %s1072_s10 = sphi %s1139_s10, %s1380_s10   ;;  %s1068_s9 = sphi %s1137_s9, %s1379_s9   ;;  %s1064_s30 = sphi %s1135_s30, %s1378_s30   ;;  %s1060_s29 = sphi %s1133_s29, %s1377_s29   ;;  %s1056_s28 = sphi %s1131_s28, %s1376_s28   ;;  %s1052_s27 = sphi %s1129_s27, %s1375_s27  }
   0x8   : > { %1365 = sst [smem:[#allocation9_spill]] %s1060_s29  ;;  %s792_s14 = sadd.s32 4294967294, %s1080_s12  }
   0x9   : > { %1366 = sst [smem:[#allocation10_spill]] %s1072_s10  ;;  %s34_s15 = sadd.s32 1, %s1072_s10 }
   0xa   : > { %1367 = sst [smem:[#allocation11_spill]] %s1076_s11  ;;  %p35_p0 = scmp.ge.s32.totalorder %s34_s15, 2 }
   0xb   : > { %s37_s16 = sadd.s32 1, %s1076_s11  ;;  %p228_p1 = scmp.ne.s32.totalorder %s1060_s29, %s1056_s28 }
   0xc   : > { %p229_p2 = scmp.eq.s32.totalorder %s791_s13, 3  ;;  %s1383_s15 = smov (%p35_p0, %s34_s15), 0 }
   0xd   : > { %1368 = sst [smem:[#allocation12_spill]] %s1383_s15  ;;  %s1385_s16 = smov (!%p35_p0, %s37_s16), %s1076_s11 }
   0xe   : > { %p1178_p3 = por %p229_p2, %p228_p1  ;;  %p234_p4 = scmp.ne.s32.totalorder %s1056_s28, %s1052_s27 }
   0xf   : > { %p39_p5 = scmp.ge.s32.totalorder %s1385_s16, 2  ;;  %p235_p6 = scmp.eq.s32.totalorder %s792_s14, 3 }
  0x10   : > { %p801_p7 = scmp.ge.s32.totalorder %s1080_s12, 1  ;;  %p330_p8 = scmp.lt.s32.totalorder %s1080_s12, 5 }
  0x11   : > { %s1387_s16 = smov (%p39_p5, %s1385_s16), 0  ;;  %p1188_p9 = por %p235_p6, %p234_p4 }
  0x12   : > { %1370 = sst [smem:[#allocation13_spill]] %s1387_s16  ;;  %p331_p10 = pnand %p801_p7, %p330_p8 }
  0x13   : > { %s1371_s18 = scalar_select %p1188_p9, 1, 0 }
  0x14   : > { %s215_s19 = ssub.s32 %s1076_s11, %s1387_s16  ;;  %s218_s20 = sadd.s32 1, %s1060_s29 }
  0x15   : > { %1372 = sst [smem:[#allocation14_spill]] %s1371_s18  ;;  %p216_p11 = scmp.eq.s32.totalorder %s215_s19, 0 }
  0x16   : > { %334 = sbr.rel (%p331_p10) target bundleno = 300 (0x12c), region = 48  ;;  %s1199_s22 = sand.u32 (!%p331_p10), 1, %s1056_s28  }
  0x17   : > { %s1196_s21 = scalar_select %p216_p11, %s1060_s29, %s218_s20  }
  0x18   : > { %s804_s23 = sshll.u32 (!%p331_p10), %s1068_s9, 1  ;;  %s802_s24 = sshll.u32 (!%p331_p10), %s1199_s22, 3 }
  0x19   : > { %1373 = sst [smem:[#allocation15_spill]] %s1196_s21  ;;  %s1204_s25 = sadd.s32 (!%p331_p10), %s1064_s30, %s804_s23 }
  0x1a   : > { %s805_s26 = sshll.u32 (!%p331_p10), %s1204_s25, 1  ;;  %s1222_s28 = scalar_lea.vmem (!%p331_p10), [#allocation2], %s802_s24 }
  0x1b   : > { %p388_p12 = scmp.lt.s32.totalorder %s805_s26, 7  ;;  %s1224_s18 = scalar_lea.vmem [#allocation4], %s802_s24 }
  0x1c   : > { %p813_p13 = scmp.ne.s32.totalorder %s1064_s30, 0 }
  0x1d   : > { %s1389_s26 = smov (!%p388_p12, %s805_s26), 7 }
  0x1e   : > { %s806_s13 = sshll.u32 %s1389_s26, 2  ;;  %s809_s14 = sshll.u32 %s1389_s26, 3 }
  0x1f   : > { %s1210_s16 = scalar_lea.vmem %s1349_s0, %s806_s13  ;;  %s1215_s10 = scalar_lea.vmem %s1350_s1, %s809_s14 }
  0x20   : > { %s1220_s23 = scalar_lea.vmem %s1351_s2, %s809_s14  ;;  %418 = sbr.rel (%p813_p13) target bundleno = 40 (0x28), region = 52 }
  0x25   : > { %v1082_v0 = vmov 0.0  }
  0x26   : > { %419 = vst [vmem:[%s1222_s28] sm:$0xff] %v1082_v0 }
  0x27   : > { %420 = vst [vmem:[%s1224_s18] sm:$0xff] %v1082_v0 }
  0x28 PF: > { %v867_v1 = vld [vmem:[%s1352_s3 + $0x38] sm:$0xff]  ;;  %vm484_vm0 = vcmask 261120   ;;  %v866_v3 = vld [vmem:[%s1352_s3 + $0x30] sm:$0xff]  ;;  %v865_v5 = vld [vmem:[%s1352_s3 + $0x28] sm:$0xff]  ;;  %v1083_v13 = vmov 0   ;;  %s855_s19 = sshll.u32 %s1068_s9, 3 }
  0x29   : > { %v510_v2 = vsel %vm484_vm0, %v867_v1, 0  ;;  %v507_v4 = vsel %vm484_vm0, %v866_v3, 0  ;;  %v504_v6 = vsel %vm484_vm0, %v865_v5, 0  ;;  %v864_v7 = vld [vmem:[%s1352_s3 + $0x20] sm:$0xff]  ;;  %v863_v9 = vld [vmem:[%s1352_s3 + $0x18] sm:$0xff]  ;;  %946 = vset.pattern.permute.xlu0 %v1083_v13  ;;  %v862_v14 = vld [vmem:[%s1352_s3 + $0x10] sm:$0xff]  ;;  %947 = vset.pattern.permute.xlu1 %v1083_v13  ;;  %s645_s15 = scalar_lea.hbm %s1356_s7, %s855_s19  ;;  %s659_s30 = scalar_lea.hbm %s1357_s8, %s855_s19 }
  0x2a   : > { %512 = vmatpush.bf16.xpose.msra.mxu0 %v510_v2  ;;  %v501_v8 = vsel %vm484_vm0, %v864_v7, 0  ;;  %v498_v10 = vsel %vm484_vm0, %v863_v9, 0  ;;  %v526_v11 = vld [vmem:[%s1215_s10] sm:$0xff]  ;;  %v495_v15 = vsel %vm484_vm0, %v862_v14, 0  ;;  %v527_v16 = vld [vmem:[%s1215_s10 + $0x8] sm:$0xff]  ;;  %s647_s10 = sshll.u32 %s1222_s28, 4  ;;  %s648_s10 = int_to_ptr.vmem [resolvable:$true] %s647_s10 }
  0x2b   : > { %v574_v12 = vld [vmem:[%s1220_s23] sm:$0xff]  ;;  %531 = vperm.xlu0 %946, %v526_v11   ;;  %v575_v17 = vld [vmem:[%s1220_s23 + $0x8] sm:$0xff]  ;;  %s649_s23 = sshll.u32 %s645_s15, 4  ;;  %s661_s9 = sshll.u32 %s1224_s18, 4  ;;  %s650_s23 = int_to_ptr.hbm [resolvable:$true] %s649_s23  ;;  %s1291_s9 = int_to_ptr.vmem [resolvable:$true] %s661_s9 }
  0x2c   : > { %578 = vperm.xlu1 %947, %v574_v12   ;;  %v861_v18 = vld [vmem:[%s1352_s3 + $0x8] sm:$0xff]  ;;  %v860_v20 = vld [vmem:[%s1352_s3] sm:$0xff]  ;;  %s968_s26 = sshra.s32 %s650_s23, 4  ;;  %s974_s19 = scalar_lea.hbm %s1356_s7, 16  ;;  %s969_s26 = int_to_ptr.hbm [resolvable:$true] %s968_s26 }
  0x2d   : > { %v492_v19 = vsel %vm484_vm0, %v861_v18, 0  ;;  %v489_v21 = vsel %vm484_vm0, %v860_v20, 0  ;;  %v859_v22 = vld [vmem:[%s1210_s16] sm:$0xff]  ;;  %s852_s16 = sshll.u32 %s1204_s25, 4  ;;  %s970_s13 = scalar_lea.hbm %s969_s26, 8 }
  0x2e   : > { %v948_v23 = vld [vmem:[%s1353_s4] ss:$0 sm:$0xff]  ;;  %p590_p0 = scmp.lt.s32.totalorder %s852_s16, 32  ;;  %s663_s16 = sshll.u32 %s659_s30, 4  ;;  %s1293_s16 = int_to_ptr.hbm [resolvable:$true] %s663_s16 }
  0x2f   : > { %v586_v45 = vld [vmem:[%s1354_s5] sm:$0x1]  ;;  %p971_p1 = scmp.ne.s32.totalorder %s969_s26, %s970_s13  ;;  %p975_p5 = scmp.lt.s32.totalorder %s969_s26, %s1356_s7 }
  0x30   : > { %s592_s24 = scalar_select %p590_p0, 1, 0  ;;  %v591_v49 = vsub.f32 1.0, %v586_v45  ;;  %v949_v52 = vld [vmem:[%s1355_s6] ss:$0 sm:$0xff] }
  0x31   : > { %p972_p2 = pnand %p971_p1, %p1178_p3  ;;  %p976_p6 = scmp.lt.s32.totalorder %s974_s19, %s970_s13 }
  0x32   : > { %513 = vmatpush.bf16.xpose.msra.mxu0 %v507_v4  ;;  %v593_v46 = vstv %s592_s24  ;;  %s630_s24 = scalar_lea.sflag [#allocation3], %s1199_s22 }
  0x33   : > { %536 = vperm.xlu0 %946, %v527_v16   ;;  %vm594_vm2 = vcmp.eq.s32.totalorder %v593_v46, 1  ;;  %p973_p4 = pneg %p972_p2  ;;  %p977_p7 = por %p976_p6, %p975_p5 }
  0x34   : > { %581 = vperm.xlu1 %947, %v575_v17   ;;  %v595_v56 = vsel %vm594_vm2, %v591_v49, %v586_v45 }
  0x35   : > { %v599_v61 = vperm.slane %v595_v56, 0  ;;  %p978_p8 = pnand %p977_p7, %p973_p4 }
  0x3a   : > { %514 = vmatpush.bf16.xpose.msra.mxu0 %v504_v6 }
  0x42   : > { %515 = vmatpush.bf16.xpose.msra.mxu0 %v501_v8 }
  0x4a   : > { %516 = vmatpush.bf16.xpose.msra.mxu0 %v498_v10 }
  0x52   : > { %517 = vmatpush.bf16.xpose.msra.mxu0 %v495_v15 }
  0x5a   : > { %518 = vmatpush.bf16.xpose.msra.mxu0 %v492_v19 }
  0x62   : > { %519 = vmatpush.bf16.xpose.msra.mxu0 %v489_v21  ;;  %v609_v21 = vld [vmem:[%s1222_s28] sm:$0x1] }
  0x69   : > { %850 = vmatmul.msk.bf16.vlgmr.msra.gmra.mxu0 %vm484_vm0, %v859_v22 }
  0x9d   : > { %v532_v24 = vpop.permute.xlu0 %531 }
  0x9e   : > { %v542_v25 = vadd.f32 %v948_v23, %v532_v24  ;;  %v579_v42 = vpop.permute.xlu1 %578  ;;  %v619_v24 = vld [vmem:[%s1224_s18] sm:$0x1] }
  0x9f   : > { %vm584_vm4 = vcmp.eq.s32.totalorder %v579_v42, %v949_v52 }
  0xa5   : > { %v537_v30 = vpop.permute.xlu0 %536 }
  0xa6   : > { %v543_v32 = vadd.f32 %v948_v23, %v537_v30  ;;  %v582_v59 = vpop.permute.xlu1 %581 }
  0xa7   : > { %vm585_vm7 = vcmp.eq.s32.totalorder %v582_v59, %v949_v52 }
  0xe6   : > { %v521_v26 = vpop.f32.mrf.mxu0 }
  0xe7   : > { %v544_v27 = vmul.f32 2.0, %v521_v26 }
  0xe9   : > { %v546_v28 = vsub.f32 %v542_v25, %v544_v27 }
  0xeb   : > { %v548_v29 = vmax.f32 %v546_v28, 1e-12 }
  0xed   : > { %950 = vrsqrt.f32 %v548_v29  ;;  %vm557_vm1 = vcmp.eq.f32.partialorder %v548_v29, inf  ;;  %v560_v53 = vand.u32 2147483648, %v548_v29  ;;  %vm559_vm3 = vcmp.eq.f32.partialorder %v548_v29, 0.0 }
  0xee   : > { %v523_v31 = vpop.f32.mrf.mxu0 }
  0xef   : > { %v545_v33 = vmul.f32 2.0, %v523_v31 }
  0xf1   : > { %v547_v34 = vsub.f32 %v543_v32, %v545_v33 }
  0xf3   : > { %v951_v35 = vpop.eup %950  ;;  %v549_v36 = vmax.f32 %v547_v34, 1e-12 }
  0xf4   : > { %v551_v37 = vmul.f32 %v951_v35, %v548_v29 }
  0xf5   : > { %952 = vrsqrt.f32 %v549_v36  ;;  %vm569_vm5 = vcmp.eq.f32.partialorder %v549_v36, inf  ;;  %v572_v62 = vand.u32 2147483648, %v549_v36  ;;  %vm571_vm6 = vcmp.eq.f32.partialorder %v549_v36, 0.0 }
  0xf6   : > { %v552_v38 = vmul.f32 %v951_v35, %v551_v37 }
  0xf8   : > { %v553_v39 = vmul.f32 0.5, %v552_v38 }
  0xfa   : > { %v554_v40 = vsub.f32 1.5, %v553_v39 }
  0xfb   : > { %v953_v41 = vpop.eup %952 }
  0xfc   : > { %v555_v43 = vmul.f32 %v951_v35, %v554_v40  ;;  %v563_v44 = vmul.f32 %v953_v41, %v549_v36 }
  0xfe   : > { %v556_v47 = vmul.f32 %v555_v43, %v548_v29  ;;  %v564_v48 = vmul.f32 %v953_v41, %v563_v44 }
 0x100   : > { %v558_v50 = vsel %vm557_vm1, %v548_v29, %v556_v47  ;;  %v565_v51 = vmul.f32 0.5, %v564_v48 }
 0x101   : > { %v561_v55 = vsel %vm559_vm3, %v560_v53, %v558_v50 }
 0x102   : > { %v566_v54 = vsub.f32 1.5, %v565_v51  ;;  %v603_v58 = vsub.f32 0.6, %v561_v55  ;;  %v596_v63 = vsel %vm584_vm4, %v561_v55, 0.0 }
 0x103   : > { %v601_v5 = vmul.f32 %v599_v61, %v596_v63 }
 0x104   : > { %v567_v57 = vmul.f32 %v953_v41, %v566_v54  ;;  %v605_v2 = vmax.f32 %v603_v58, 0.0 }
 0x106   : > { %v568_v60 = vmul.f32 %v567_v57, %v549_v36  ;;  %v607_v9 = vsel %vm584_vm4, 0.0, %v605_v2 }
 0x108   : > { %v570_v0 = vsel %vm569_vm5, %v549_v36, %v568_v60 }
 0x109   : > { %v573_v1 = vsel %vm571_vm6, %v572_v62, %v570_v0 }
 0x10a   : > { %v597_v3 = vsel %vm585_vm7, %v573_v1, 0.0  ;;  %v604_v4 = vsub.f32 0.6, %v573_v1 }
 0x10b   : > { %v602_v6 = vmul.f32 %v599_v61, %v597_v3 }
 0x10c   : > { %v606_v7 = vmax.f32 %v604_v4, 0.0 }
 0x10d   : > { %v610_v8 = vadd.f32 %v602_v6, %v601_v5 }
 0x10e   : > { %v608_v10 = vsel %vm585_vm7, 0.0, %v606_v7 }
 0x10f   : > { %v611_v11 = vrot.slane %v610_v8, 4  ;;  %v620_v12 = vadd.f32 %v608_v10, %v607_v9 }
 0x111   : > { %v612_v13 = vadd.f32 %v611_v11, %v610_v8  ;;  %v621_v14 = vrot.slane %v620_v12, 4 }
 0x113   : > { %v613_v15 = vrot.slane %v612_v13, 2  ;;  %v622_v16 = vadd.f32 %v621_v14, %v620_v12 }
 0x115   : > { %v614_v17 = vadd.f32 %v613_v15, %v612_v13  ;;  %v623_v18 = vrot.slane %v622_v16, 2 }
 0x117   : > { %v624_v19 = vadd.f32 %v623_v18, %v622_v16  ;;  %v615_v20 = vrot.slane %v614_v17, 1 }
 0x119   : > { %v625_v22 = vrot.slane %v624_v19, 1  ;;  %v616_v23 = vadd.f32 %v615_v20, %v614_v17 }
 0x11b   : > { %v617_v25 = vadd.f32 %v616_v23, %v609_v21  ;;  %v626_v26 = vadd.f32 %v625_v22, %v624_v19 }
 0x11d   : > { %618 = vst [vmem:[%s1222_s28] sm:$0x1] %v617_v25  ;;  %v627_v27 = vadd.f32 %v626_v26, %v619_v24 }
 0x11e   : > { %981 = shalt.err (!%p978_p8)
}
 0x11f   : > { %868 = dma.vmem_to_hbm [thread:$0]  (%p1178_p3), %s648_s10, 128, %s650_s23, %s630_s24   ;;  %628 = vst [vmem:[%s1224_s18] sm:$0x1] %v627_v27 }
 0x120   : > { %s635_s28 = scalar_lea.sflag [#allocation5], %s1199_s22  ;;  %s996_s15 = sshra.s32 %s1293_s16, 4  ;;  %s997_s15 = int_to_ptr.hbm [resolvable:$true] %s996_s15 }
 0x121   : > { %s998_s29 = scalar_lea.hbm %s997_s15, 8  ;;  %s1002_s26 = scalar_lea.hbm %s1357_s8, 16 }
 0x122   : > { %p999_p10 = scmp.ne.s32.totalorder %s997_s15, %s998_s29  ;;  %p1003_p13 = scmp.lt.s32.totalorder %s997_s15, %s1357_s8 }
 0x123   : > { %p1004_p0 = scmp.lt.s32.totalorder %s1002_s26, %s998_s29 }
 0x124   : > { %p1000_p11 = pnand %p999_p10, %p1178_p3 }
 0x125   : > { %p1005_p1 = por %p1004_p0, %p1003_p13 }
 0x126   : > { %p1001_p12 = pneg %p1000_p11 }
 0x128   : > { %p1006_p2 = pnand %p1005_p1, %p1001_p12 }
 0x12a   : > { %1009 = shalt.err (!%p1006_p2)
}
 0x12b   : > { %869 = dma.vmem_to_hbm [thread:$0]  (%p1178_p3), %s1291_s9, 128, %s1293_s16, %s635_s28  }
 0x12c PF: > { %p879_p4 = scmp.ge.s32.totalorder %s1080_s12, 2  ;;  %s675_s22 = sand.u32 1, %s1052_s27  }
 0x12d   : > { %s676_s10 = scalar_lea.sflag [#allocation3], %s675_s22 }
 0x12e   : > { %p873_p5 = pnand %p879_p4, %p1188_p9 }
 0x130   : > { %p874_p6 = pneg %p873_p5 }
 0x132   : > { %1043 = dma.done.wait (%p874_p6), %s676_s10, 128  }
 0x133   : > { %1045 = vsyncadd (%p874_p6), %s676_s10, 4294967168  ;;  %s686_s23 = scalar_lea.sflag [#allocation5], %s675_s22 }
 0x134   : > { %1047 = dma.done.wait (%p874_p6), %s686_s23, 128  }
 0x135   : > { %1049 = vsyncadd (%p874_p6), %s686_s23, 4294967168  ;;  %s25_s12 = sadd.s32 1, %s1080_s12   ;;  %s1375_s27 = sld [smem:[#allocation8_spill]] }
 0x136   : > { %p22_p7 = scmp.ge.s32.totalorder %s25_s12, 6   ;;  %s1376_s28 = sld [smem:[#allocation9_spill]] }
 0x137   : > { %s1377_s29 = sld [smem:[#allocation15_spill]] }
 0x138   : > { %s1378_s30 = sld [smem:[#allocation10_spill]]  ;;  %24 = sbr.rel (!%p22_p7) target bundleno = 7 (0x7), region = 110 }
 0x139   : > { %s1379_s9 = sld [smem:[#allocation11_spill]] }
 0x13a   : > { %s1380_s10 = sld [smem:[#allocation12_spill]] }
 0x13b   : > { %s1381_s11 = sld [smem:[#allocation13_spill]] }
 0x13d   :  { %692 = vsyncpa [#allocation3], 1 }
 0x13e   :  { %694 = vsyncpa [#allocation3 + $0x1], 1 }
 0x13f   :  { %695 = vsyncpa [#allocation5], 1 }
 0x140   :  { %697 = vsyncpa [#allocation5 + $0x1], 1 }

</bundles_post_ra>
